<compile_context>
chip_gen: v6e
topology: v6e:2x2x1
jax: 0.10.0
libtpu: 0.0.40
codegen_flags: <defaults>
</compile_context>

<pallas_src>
import jax
import jax.numpy as jnp
from jax.experimental import pallas as pl
from jax.experimental.pallas import tpu as pltpu


# ----------------------------------------------------------------------------
# Pallas kernel: tiled matmul with fused bias epilogue
# ----------------------------------------------------------------------------
def _matmul_bias_kernel(a_ref, b_ref, bias_ref, o_ref, acc_ref):
    @pl.when(pl.program_id(2) == 0)
    def _():
        acc_ref[...] = jnp.zeros_like(acc_ref)

    acc_ref[...] += jnp.dot(a_ref[...], b_ref[...],
                            preferred_element_type=jnp.float32)

    @pl.when(pl.program_id(2) == pl.num_programs(2) - 1)
    def _():
        o_ref[...] = (acc_ref[...] + bias_ref[...]).astype(o_ref.dtype)


# ----------------------------------------------------------------------------
# Wrapper: adaptive tiling + pallas_call
# ----------------------------------------------------------------------------
def _round_up(x, m):
    return ((x + m - 1) // m) * m


def _pad2d(x, rows, cols):
    pr, pc = rows - x.shape[0], cols - x.shape[1]
    if pr == 0 and pc == 0:
        return x
    return jnp.pad(x, ((0, pr), (0, pc)))


def matmul_bias(a, b, bias, compute_dtype=jnp.float32):
    """(M, K) @ (K, N) + bias[N] -> (M, N) float32, via a tiled Pallas MXU kernel."""
    M, K = a.shape
    K2, N = b.shape
    assert K == K2, (a.shape, b.shape)

    # --- adaptive tile selection -------------------------------------------
    # M: pad only to the sublane multiple (8) when small, cap the tile at 256.
    TM = min(_round_up(M, 8), 256)
    Mp = _round_up(M, TM)
    # N (embed_dim): lane axis, must be a multiple of 128; use 256 when it divides.
    Np = _round_up(N, 128)
    TN = 256 if Np % 256 == 0 else 128
    # K: take the whole reduction in one grid step when it fits comfortably.
    Kp = _round_up(K, 128)
    if Kp <= 2048:
        TK = Kp
    else:
        TK = 2048
        Kp = _round_up(Kp, TK)

    a_p = _pad2d(a, Mp, Kp).astype(compute_dtype)
    b_p = _pad2d(b, Kp, Np).astype(compute_dtype)
    bias_p = _pad2d(bias.astype(jnp.float32).reshape(1, N), 1, Np)

    grid = (Mp // TM, Np // TN, Kp // TK)
    out = pl.pallas_call(
        _matmul_bias_kernel,
        out_shape=jax.ShapeDtypeStruct((Mp, Np), jnp.float32),
        grid_spec=pltpu.PrefetchScalarGridSpec(
            num_scalar_prefetch=0,
            grid=grid,
            in_specs=[
                pl.BlockSpec((TM, TK), lambda i, j, k: (i, k)),
                pl.BlockSpec((TK, TN), lambda i, j, k: (k, j)),
                pl.BlockSpec((1, TN), lambda i, j, k: (0, j)),
            ],
            out_specs=pl.BlockSpec((TM, TN), lambda i, j, k: (i, j)),
            scratch_shapes=[pltpu.VMEM((TM, TN), jnp.float32)],
        ),
        compiler_params=pltpu.CompilerParams(
            dimension_semantics=("parallel", "parallel", "arbitrary")),
    )(a_p, b_p, bias_p)

    if Mp != M or Np != N:
        out = out[:M, :N]
    return out


# ----------------------------------------------------------------------------
# MLP forward (matches the PyTorch module)
# ----------------------------------------------------------------------------
def mlp_forward(params, x, compute_dtype=jnp.float32):
    """x: (N, C, H, W) -> (N, H*W, embed_dim).

    params["proj_w"]: (embed_dim, input_dim)  -- nn.Linear weight layout
    params["proj_b"]: (embed_dim,)
    """
    w, b = params["proj_w"], params["proj_b"]
    n, c, h, ww = x.shape
    # x.flatten(2).transpose(1, 2)  (layout glue handled by XLA)
    a = jnp.transpose(x.reshape(n, c, h * ww), (0, 2, 1)).reshape(n * h * ww, c)
    out = matmul_bias(a, jnp.transpose(w), b, compute_dtype=compute_dtype)
    return out.reshape(n, h * ww, -1)


# ----------------------------------------------------------------------------
# Self-test
# ----------------------------------------------------------------------------
if __name__ == "__main__":
    key = jax.random.PRNGKey(0)
    kx, kw, kb = jax.random.split(key, 3)

    batch, input_dim, embed_dim, H, W = 2, 256, 128, 16, 16
    x = jax.random.normal(kx, (batch, input_dim, H, W), jnp.float32)
    params = {
        "proj_w": jax.random.normal(kw, (embed_dim, input_dim), jnp.float32) * 0.02,
        "proj_b": jax.random.normal(kb, (embed_dim,), jnp.float32) * 0.01,
    }

    fwd = jax.jit(mlp_forward)
    out = jax.block_until_ready(fwd(params, x))

    assert out.shape == (batch, H * W, embed_dim), out.shape
    assert bool(jnp.all(jnp.isfinite(out)))

    # reference: x.flatten(2).transpose(1,2) @ W^T + b  (full-precision XLA)
    a_ref = jnp.transpose(x.reshape(batch, input_dim, H * W), (0, 2, 1))
    ref = jnp.einsum("nlc,ec->nle", a_ref, params["proj_w"],
                     precision=jax.lax.Precision.HIGHEST) + params["proj_b"]
    assert jnp.allclose(out, ref, atol=1e-3, rtol=1e-3), float(
        jnp.max(jnp.abs(out - ref)))

    print("KERNEL_OK")
</pallas_src>

<mosaic_0001>
module attributes {stable_mosaic.version = 11 : i64} {
  func.func @_matmul_bias_kernel(%arg0: i32, %arg1: i32, %arg2: i32, %arg3: memref<256x256xf32, #tpu.memory_space<vmem>>, %arg4: memref<256x128xf32, #tpu.memory_space<vmem>>, %arg5: memref<1x128xf32, #tpu.memory_space<vmem>>, %arg6: memref<256x128xf32, #tpu.memory_space<vmem>>, %arg7: memref<256x128xf32, #tpu.memory_space<vmem>>) attributes {dimension_semantics = [#tpu.dimension_semantics<parallel>, #tpu.dimension_semantics<parallel>, #tpu.dimension_semantics<arbitrary>], iteration_bounds = array<i64: 2, 1, 1>, scalar_prefetch = 0 : i64, scratch_operands = 1 : i64, tpu.core_type = #tpu.core_type<tc>, window_params = [{transform_indices = @transform_0, window_bounds = array<i64: 256, 256>}, {transform_indices = @transform_1, window_bounds = array<i64: 256, 128>}, {transform_indices = @transform_2, window_bounds = array<i64: 1, 128>}, {transform_indices = @transform_3, window_bounds = array<i64: 256, 128>}]} {
    %c0_i32 = arith.constant 0 : i32
    %0 = arith.cmpi eq, %arg2, %c0_i32 : i32
    %1 = arith.extui %0 : i1 to i32
    %c0_i32_0 = arith.constant 0 : i32
    %2 = arith.cmpi ne, %1, %c0_i32_0 : i32
    scf.if %2 {
      %cst_10 = arith.constant 0.000000e+00 : f32
      %12 = vector.broadcast %cst_10 : f32 to vector<256x128xf32>
      %c0_11 = arith.constant 0 : index
      %c0_12 = arith.constant 0 : index
      %13 = vector.load %arg7[%c0_11, %c0_12] : memref<256x128xf32, #tpu.memory_space<vmem>>, vector<256x128xf32>
      tpu.vector_store %arg7[%c0_11, %c0_12], %12 {strides = array<i32>} : memref<256x128xf32, #tpu.memory_space<vmem>>, vector<256x128xf32>,
    } else {
    }
    %c0 = arith.constant 0 : index
    %c0_1 = arith.constant 0 : index
    %3 = vector.load %arg7[%c0, %c0_1] : memref<256x128xf32, #tpu.memory_space<vmem>>, vector<256x128xf32>
    %c0_2 = arith.constant 0 : index
    %c0_3 = arith.constant 0 : index
    %4 = vector.load %arg3[%c0_2, %c0_3] : memref<256x256xf32, #tpu.memory_space<vmem>>, vector<256x256xf32>
    %c0_4 = arith.constant 0 : index
    %c0_5 = arith.constant 0 : index
    %5 = vector.load %arg4[%c0_4, %c0_5] : memref<256x128xf32, #tpu.memory_space<vmem>>, vector<256x128xf32>
    %cst = arith.constant dense<0.000000e+00> : vector<256x128xf32>
    %6 = tpu.matmul %4, %5, %cst {dimension_numbers = #tpu.dot_dimension_numbers<[1], [0], [0], [1], [0, 0, 1, 1], [], []>} : vector<256x256xf32>, vector<256x128xf32>, vector<256x128xf32> -> vector<256x128xf32>
    %7 = arith.addf %3, %6 : vector<256x128xf32>
    %c0_6 = arith.constant 0 : index
    %c0_7 = arith.constant 0 : index
    %8 = vector.load %arg7[%c0_6, %c0_7] : memref<256x128xf32, #tpu.memory_space<vmem>>, vector<256x128xf32>
    tpu.vector_store %arg7[%c0_6, %c0_7], %7 {strides = array<i32>} : memref<256x128xf32, #tpu.memory_space<vmem>>, vector<256x128xf32>,
    %c0_i32_8 = arith.constant 0 : i32
    %9 = arith.cmpi eq, %arg2, %c0_i32_8 : i32
    %10 = arith.extui %9 : i1 to i32
    %c0_i32_9 = arith.constant 0 : i32
    %11 = arith.cmpi ne, %10, %c0_i32_9 : i32
    scf.if %11 {
      %c0_10 = arith.constant 0 : index
      %c0_11 = arith.constant 0 : index
      %12 = vector.load %arg7[%c0_10, %c0_11] : memref<256x128xf32, #tpu.memory_space<vmem>>, vector<256x128xf32>
      %c0_12 = arith.constant 0 : index
      %c0_13 = arith.constant 0 : index
      %13 = vector.load %arg5[%c0_12, %c0_13] : memref<1x128xf32, #tpu.memory_space<vmem>>, vector<1x128xf32>
      %14 = vector.broadcast %13 : vector<1x128xf32> to vector<256x128xf32>
      %15 = arith.addf %12, %14 : vector<256x128xf32>
      %c0_14 = arith.constant 0 : index
      %c0_15 = arith.constant 0 : index
      %16 = vector.load %arg6[%c0_14, %c0_15] : memref<256x128xf32, #tpu.memory_space<vmem>>, vector<256x128xf32>
      tpu.vector_store %arg6[%c0_14, %c0_15], %15 {strides = array<i32>} : memref<256x128xf32, #tpu.memory_space<vmem>>, vector<256x128xf32>,
    } else {
    }
    return
  }
  func.func @transform_0(%arg0: i32, %arg1: i32, %arg2: i32) -> (i32, i32) {
    %c0_i32 = arith.constant 0 : i32
    return %arg0, %arg2 : i32, i32
  }
  func.func @transform_1(%arg0: i32, %arg1: i32, %arg2: i32) -> (i32, i32) {
    %c0_i32 = arith.constant 0 : i32
    return %arg2, %arg1 : i32, i32
  }
  func.func @transform_2(%arg0: i32, %arg1: i32, %arg2: i32) -> (i32, i32) {
    %c0_i32 = arith.constant 0 : i32
    %c0_i32_0 = arith.constant 0 : i32
    return %c0_i32, %arg1 : i32, i32
  }
  func.func @transform_3(%arg0: i32, %arg1: i32, %arg2: i32) -> (i32, i32) {
    %c0_i32 = arith.constant 0 : i32
    return %arg0, %arg1 : i32, i32
  }
}

</mosaic_0001>

<bundles_post_ra>
// kernel: mlp_forward.1
= control target key start
LH: loop header
LB: loop body
LE: loop exit
PB: predicated region body
PF: predicated region fallthrough
CT: control target
= control target key end

     0   :  { %8 = vsyncpa [#allocation4], 0  ;;  %s1693_s0 = inlined_call_operand.hbm [shape: f32[512,256], index: 0, kind: input, shape index: {}]   ;;  %s1694_s1 = inlined_call_operand.vmem [shape: f32[256,128], index: 1, kind: input, shape index: {}]   ;;  %s1695_s2 = inlined_call_operand.vmem [shape: f32[1,128], index: 2, kind: input, shape index: {}]   ;;  %s1696_s3 = inlined_call_operand.hbm [shape: f32[512,128], index: 3, kind: output, shape index: {}]  }
   0x1   :  { %10 = vsyncpa [#allocation4 + $0x1], 0 }
   0x2   :  { %11 = vsyncpa [#allocation5], 0 }
   0x3   :  { %13 = vsyncpa [#allocation5 + $0x1], 0  ;;  %s1248_s12 = smov 0   ;;  %s1250_s13 = smov 0  }
   0x4   :  { %s1252_s14 = smov 0   ;;  %s1254_s15 = smov 0  }
   0x5   :  { %s1256_s16 = smov 0   ;;  %s1258_s17 = smov 0  }
   0x6 LB: > { %s958_s18 = sadd.s32 4294967295, %s1219_s17   ;;  %s959_s19 = sadd.s32 4294967294, %s1219_s17   ;;  %s1219_s17 = sphi %s1258_s17, %s19_s17   ;;  %s1215_s16 = sphi %s1256_s16, %s1707_s16   ;;  %s1211_s15 = sphi %s1254_s15, %s1706_s15   ;;  %s1207_s14 = sphi %s1252_s14, %s1705_s14   ;;  %s1203_s13 = sphi %s1250_s13, %s1704_s13   ;;  %s1199_s12 = sphi %s1248_s12, %s1703_s12  }
   0x7   : > { %s38_s20 = sadd.s32 1, %s1215_s16  ;;  %s47_s21 = sadd.s32 1, %s1207_s14 }
   0x8   : > { %p40_p0 = scmp.ge.s32.totalorder %s38_s20, 2  ;;  %p54_p1 = scmp.ne.s32.totalorder %s1207_s14, %s1203_s13 }
   0x9   : > { %p55_p2 = scmp.eq.s32.totalorder %s1219_s17, 0  ;;  %p60_p3 = scmp.ne.s32.totalorder %s1203_s13, %s1199_s12 }
   0xa   : > { %s1709_s20 = smov (%p40_p0, %s38_s20), 0  ;;  %p61_p5 = scmp.eq.s32.totalorder %s958_s18, 0 }
   0xb   : > { %p1289_p4 = por %p55_p2, %p54_p1  ;;  %s42_s23 = ssub.s32 %s1215_s16, %s1709_s20 }
   0xc   : > { %p140_p6 = scmp.eq.s32.totalorder %s958_s18, 1  ;;  %p45_p7 = scmp.eq.s32.totalorder %s42_s23, 0 }
   0xd   : > { %p1295_p8 = por %p61_p5, %p60_p3  ;;  %p146_p10 = scmp.eq.s32.totalorder %s959_s19, 1 }
   0xe   : > { %p1299_p9 = por %p140_p6, %p54_p1  ;;  %p1056_p13 = scmp.lt.s32.totalorder %s1219_s17, 2 }
   0xf   : > { %s1304_s26 = scalar_select %p45_p7, %s1207_s14, %s47_s21  }
  0x10   : > { %p1306_p11 = por %p146_p10, %p60_p3  ;;  %s184_s28 = sand.u32 1, %s1207_s14  }
  0x11   : > { %s964_s29 = sshll.u32 %s184_s28, 9  ;;  %s978_s30 = sshll.u32 %s1215_s16, 13 }
  0x12   : > { %s197_s6 = scalar_lea.hbm %s1693_s0, %s978_s30  ;;  %s188_s7 = scalar_lea.vmem [#allocation3], %s964_s29 }
  0x13   : > { %s198_s8 = sshll.u32 %s188_s7, 4  ;;  %p1319_p0 = pnand %p1056_p13, %p1289_p4  ;;  %s199_s8 = int_to_ptr.vmem [resolvable:$true] %s198_s8 }
  0x14   : > { %p968_p1 = scmp.ge.s32.totalorder %s1219_s17, 1  ;;  %s185_s10 = scalar_lea.sflag [#allocation4], %s184_s28 }
  0x15   : > { %p1113_p2 = pneg %p1319_p0  ;;  %s1124_s11 = scalar_lea.vmem %s199_s8, 8192 }
  0x16   : > { %p1125_p3 = scmp.ne.s32.totalorder %s199_s8, %s1124_s11  ;;  %s1221_s18 = smov [#allocation3]  }
  0x17   : > { %s1129_s19 = sshll.u32 %s1221_s18, 4  ;;  %s1130_s19 = int_to_ptr.vmem [resolvable:$false] %s1129_s19 }
  0x18   : > { %p1127_p5 = pnand %p1125_p3, %p1113_p2  ;;  %s1131_s21 = scalar_lea.vmem %s1130_s19, 16384 }
  0x19   : > { %p1132_p7 = scmp.lt.s32.totalorder %s199_s8, %s1130_s19  ;;  %p1133_p10 = scmp.lt.s32.totalorder %s1131_s21, %s1124_s11 }
  0x1a   : > { %p1128_p6 = pneg %p1127_p5 }
  0x1b   : > { %p1134_p12 = por %p1133_p10, %p1132_p7 }
  0x1d   : > { %p1135_p4 = pnand %p1134_p12, %p1128_p6 }
  0x1f   : > { %1138 = shalt.err (!%p1135_p4)
}
  0x20   : > { %s1222_s22 = smov 256   ;;  %s1223_s23 = smov 16  }
  0x21   : > { %1051 = dma.hbm_to_vmem [thread:$0]  (!%p1319_p0), %s197_s6, 8192, %s199_s8, %s185_s10, %s1222_s22, %s1222_s22, %s1223_s23  }
  0x22   : > { %p206_p13 = scmp.lt.s32.totalorder %s1219_s17, 3 }
  0x24   : > { %p207_p2 = pnand %p968_p1, %p206_p13 }
  0x25   : > { %s1332_s28 = sand.u32 (!%p207_p2), 1, %s1203_s13  }
  0x26   : > { %210 = sbr.rel (%p207_p2) target bundleno = 379 (0x17b), region = 32  ;;  %s969_s29 = sshll.u32 (!%p207_p2), %s1332_s28, 9 }
  0x27   : > { %s213_s30 = scalar_lea.sflag (!%p207_p2), [#allocation4], %s1332_s28  ;;  %s1336_s4 = scalar_lea.vmem (!%p207_p2), [#allocation3], %s969_s29 }
  0x2b   : > { %1190 = dma.done.wait (%p1295_p8), %s213_s30, 8192  }
  0x2c   : > { %1192 = vsyncadd (%p1295_p8), %s213_s30, 4294959104  ;;  %v1224_v0 = vmov 0.0   ;;  %v412_v1 = vld [vmem:[%s1694_s1 + $0x78] sm:$0xff]  ;;  %v411_v2 = vld [vmem:[%s1694_s1 + $0x70] sm:$0xff]  ;;  %s970_s24 = sshll.u32 %s1332_s28, 8  ;;  %s1225_s29 = smov [#allocation6]  }
  0x2d   : > { %429 = vmatprep.subr.mxu0 %v1224_v0  ;;  %980 = vmatprep.subr.mxu1 %v1224_v0  ;;  %v410_v3 = vld [vmem:[%s1694_s1 + $0x68] sm:$0xff]  ;;  %v409_v4 = vld [vmem:[%s1694_s1 + $0x60] sm:$0xff]  ;;  %v408_v5 = vld [vmem:[%s1694_s1 + $0x58] sm:$0xff]  ;;  %s1574_s11 = scalar_lea.vmem [#allocation6], %s970_s24  ;;  %s1143_s30 = sshll.u32 %s1225_s29, 4  ;;  %s1144_s30 = int_to_ptr.vmem [resolvable:$false] %s1143_s30 }
  0x2e   : > { %430 = vmatpush1.msra.mxu0 %v412_v1  ;;  %1012 = vmatpush1.msra.mxu1 %v412_v1  ;;  %v407_v6 = vld [vmem:[%s1694_s1 + $0x50] sm:$0xff]  ;;  %v406_v7 = vld [vmem:[%s1694_s1 + $0x48] sm:$0xff]  ;;  %v405_v8 = vld [vmem:[%s1694_s1 + $0x40] sm:$0xff]  ;;  %s839_s18 = sshll.u32 %s1574_s11, 4  ;;  %s1145_s5 = scalar_lea.vmem %s1144_s30, 8192  ;;  %s1641_s18 = int_to_ptr.vmem [resolvable:$true] %s839_s18 }
  0x2f   : > { %431 = vmatprep.subr.mxu0 %v1224_v0  ;;  %981 = vmatprep.subr.mxu1 %v1224_v0  ;;  %v404_v9 = vld [vmem:[%s1694_s1 + $0x38] sm:$0xff]  ;;  %v403_v10 = vld [vmem:[%s1694_s1 + $0x30] sm:$0xff]  ;;  %v402_v11 = vld [vmem:[%s1694_s1 + $0x28] sm:$0xff]  ;;  %s1139_s23 = scalar_lea.vmem %s1641_s18, 4096  ;;  %p1146_p1 = scmp.lt.s32.totalorder %s1641_s18, %s1144_s30 }
  0x30   : > { %432 = vmatpush1.msra.mxu0 %v411_v2  ;;  %1013 = vmatpush1.msra.mxu1 %v411_v2  ;;  %v401_v12 = vld [vmem:[%s1694_s1 + $0x20] sm:$0xff]  ;;  %v400_v13 = vld [vmem:[%s1694_s1 + $0x18] sm:$0xff]  ;;  %v399_v14 = vld [vmem:[%s1694_s1 + $0x10] sm:$0xff]  ;;  %p1140_p8 = scmp.ne.s32.totalorder %s1641_s18, %s1139_s23  ;;  %p1147_p3 = scmp.lt.s32.totalorder %s1145_s5, %s1139_s23 }
  0x31   : > { %433 = vmatprep.subr.mxu0 %v1224_v0  ;;  %982 = vmatprep.subr.mxu1 %v1224_v0  ;;  %v398_v15 = vld [vmem:[%s1694_s1 + $0x8] sm:$0xff]  ;;  %v397_v16 = vld [vmem:[%s1694_s1] sm:$0xff]  ;;  %v428_v17 = vld [vmem:[%s1694_s1 + $0xf8] sm:$0xff] }
  0x32   : > { %434 = vmatpush1.msra.mxu0 %v410_v3  ;;  %1014 = vmatpush1.msra.mxu1 %v410_v3  ;;  %v427_v18 = vld [vmem:[%s1694_s1 + $0xf0] sm:$0xff]  ;;  %v426_v19 = vld [vmem:[%s1694_s1 + $0xe8] sm:$0xff]  ;;  %v425_v20 = vld [vmem:[%s1694_s1 + $0xe0] sm:$0xff]  ;;  %p1141_p12 = pnand %p1140_p8, %p1299_p9  ;;  %p1148_p5 = por %p1147_p3, %p1146_p1 }
  0x33   : > { %435 = vmatprep.subr.mxu0 %v1224_v0  ;;  %983 = vmatprep.subr.mxu1 %v1224_v0  ;;  %v424_v21 = vld [vmem:[%s1694_s1 + $0xd8] sm:$0xff]  ;;  %v423_v22 = vld [vmem:[%s1694_s1 + $0xd0] sm:$0xff]  ;;  %v422_v23 = vld [vmem:[%s1694_s1 + $0xc8] sm:$0xff] }
  0x34   : > { %436 = vmatpush1.msra.mxu0 %v409_v4  ;;  %1015 = vmatpush1.msra.mxu1 %v409_v4  ;;  %v421_v24 = vld [vmem:[%s1694_s1 + $0xc0] sm:$0xff]  ;;  %v420_v25 = vld [vmem:[%s1694_s1 + $0xb8] sm:$0xff]  ;;  %v419_v26 = vld [vmem:[%s1694_s1 + $0xb0] sm:$0xff]  ;;  %p1142_p0 = pneg %p1141_p12 }
  0x35   : > { %437 = vmatprep.subr.mxu0 %v1224_v0  ;;  %984 = vmatprep.subr.mxu1 %v1224_v0  ;;  %v418_v27 = vld [vmem:[%s1694_s1 + $0xa8] sm:$0xff]  ;;  %v417_v28 = vld [vmem:[%s1694_s1 + $0xa0] sm:$0xff]  ;;  %v416_v29 = vld [vmem:[%s1694_s1 + $0x98] sm:$0xff] }
  0x36   : > { %438 = vmatpush1.msra.mxu0 %v408_v5  ;;  %1016 = vmatpush1.msra.mxu1 %v408_v5  ;;  %v415_v30 = vld [vmem:[%s1694_s1 + $0x90] sm:$0xff]  ;;  %v414_v31 = vld [vmem:[%s1694_s1 + $0x88] sm:$0xff]  ;;  %v413_v32 = vld [vmem:[%s1694_s1 + $0x80] sm:$0xff]  ;;  %p1149_p6 = pnand %p1148_p5, %p1142_p0 }
  0x37   : > { %439 = vmatprep.subr.mxu0 %v1224_v0  ;;  %985 = vmatprep.subr.mxu1 %v1224_v0  ;;  %v334_v33 = vld [vmem:[%s1336_s4 + $0x8] sm:$0xff]  ;;  %v333_v35 = vld [vmem:[%s1336_s4] sm:$0xff]  ;;  %v336_v37 = vld [vmem:[%s1336_s4 + $0x18] sm:$0xff] }
  0x38   : > { %440 = vmatpush1.msra.mxu0 %v407_v6  ;;  %1017 = vmatpush1.msra.mxu1 %v407_v6  ;;  %v366_v34 = vld [vmem:[%s1336_s4 + $0x108] sm:$0xff]  ;;  %v365_v36 = vld [vmem:[%s1336_s4 + $0x100] sm:$0xff]  ;;  %v368_v38 = vld [vmem:[%s1336_s4 + $0x118] sm:$0xff] }
  0x39   : > { %441 = vmatprep.subr.mxu0 %v1224_v0  ;;  %986 = vmatprep.subr.mxu1 %v1224_v0  ;;  %v335_v39 = vld [vmem:[%s1336_s4 + $0x10] sm:$0xff]  ;;  %v338_v41 = vld [vmem:[%s1336_s4 + $0x28] sm:$0xff]  ;;  %v337_v43 = vld [vmem:[%s1336_s4 + $0x20] sm:$0xff] }
  0x3a   : > { %442 = vmatpush1.msra.mxu0 %v406_v7  ;;  %1018 = vmatpush1.msra.mxu1 %v406_v7  ;;  %v367_v40 = vld [vmem:[%s1336_s4 + $0x110] sm:$0xff]  ;;  %v370_v42 = vld [vmem:[%s1336_s4 + $0x128] sm:$0xff]  ;;  %v369_v44 = vld [vmem:[%s1336_s4 + $0x120] sm:$0xff] }
  0x3b   : > { %443 = vmatprep.subr.mxu0 %v1224_v0  ;;  %987 = vmatprep.subr.mxu1 %v1224_v0  ;;  %v340_v45 = vld [vmem:[%s1336_s4 + $0x38] sm:$0xff]  ;;  %v339_v47 = vld [vmem:[%s1336_s4 + $0x30] sm:$0xff]  ;;  %v342_v49 = vld [vmem:[%s1336_s4 + $0x48] sm:$0xff] }
  0x3c   : > { %444 = vmatpush1.msra.mxu0 %v405_v8  ;;  %1019 = vmatpush1.msra.mxu1 %v405_v8  ;;  %v372_v46 = vld [vmem:[%s1336_s4 + $0x138] sm:$0xff]  ;;  %v371_v48 = vld [vmem:[%s1336_s4 + $0x130] sm:$0xff]  ;;  %v374_v50 = vld [vmem:[%s1336_s4 + $0x148] sm:$0xff] }
  0x3d   : > { %445 = vmatprep.subr.mxu0 %v1224_v0  ;;  %988 = vmatprep.subr.mxu1 %v1224_v0  ;;  %v341_v51 = vld [vmem:[%s1336_s4 + $0x40] sm:$0xff]  ;;  %v344_v53 = vld [vmem:[%s1336_s4 + $0x58] sm:$0xff]  ;;  %v343_v55 = vld [vmem:[%s1336_s4 + $0x50] sm:$0xff] }
  0x3e   : > { %446 = vmatpush1.msra.mxu0 %v404_v9  ;;  %1020 = vmatpush1.msra.mxu1 %v404_v9  ;;  %v373_v52 = vld [vmem:[%s1336_s4 + $0x140] sm:$0xff]  ;;  %v376_v54 = vld [vmem:[%s1336_s4 + $0x158] sm:$0xff]  ;;  %v375_v56 = vld [vmem:[%s1336_s4 + $0x150] sm:$0xff] }
  0x3f   : > { %447 = vmatprep.subr.mxu0 %v1224_v0  ;;  %989 = vmatprep.subr.mxu1 %v1224_v0  ;;  %v346_v57 = vld [vmem:[%s1336_s4 + $0x68] sm:$0xff]  ;;  %v345_v59 = vld [vmem:[%s1336_s4 + $0x60] sm:$0xff]  ;;  %v348_v61 = vld [vmem:[%s1336_s4 + $0x78] sm:$0xff] }
  0x40   : > { %448 = vmatpush1.msra.mxu0 %v403_v10  ;;  %1021 = vmatpush1.msra.mxu1 %v403_v10  ;;  %v378_v58 = vld [vmem:[%s1336_s4 + $0x168] sm:$0xff]  ;;  %v377_v60 = vld [vmem:[%s1336_s4 + $0x160] sm:$0xff]  ;;  %v380_v62 = vld [vmem:[%s1336_s4 + $0x178] sm:$0xff] }
  0x41   : > { %449 = vmatprep.subr.mxu0 %v1224_v0  ;;  %990 = vmatprep.subr.mxu1 %v1224_v0  ;;  %v347_v63 = vld [vmem:[%s1336_s4 + $0x70] sm:$0xff]  ;;  %v350_v1 = vld [vmem:[%s1336_s4 + $0x88] sm:$0xff]  ;;  %v349_v3 = vld [vmem:[%s1336_s4 + $0x80] sm:$0xff] }
  0x42   : > { %450 = vmatpush1.msra.mxu0 %v402_v11  ;;  %1022 = vmatpush1.msra.mxu1 %v402_v11  ;;  %v382_v2 = vld [vmem:[%s1336_s4 + $0x188] sm:$0xff]  ;;  %v381_v4 = vld [vmem:[%s1336_s4 + $0x180] sm:$0xff]  ;;  %v352_v5 = vld [vmem:[%s1336_s4 + $0x98] sm:$0xff] }
  0x43   : > { %451 = vmatprep.subr.mxu0 %v1224_v0  ;;  %991 = vmatprep.subr.mxu1 %v1224_v0  ;;  %v384_v6 = vld [vmem:[%s1336_s4 + $0x198] sm:$0xff]  ;;  %v351_v7 = vld [vmem:[%s1336_s4 + $0x90] sm:$0xff]  ;;  %v354_v9 = vld [vmem:[%s1336_s4 + $0xa8] sm:$0xff] }
  0x44   : > { %452 = vmatpush1.msra.mxu0 %v401_v12  ;;  %1023 = vmatpush1.msra.mxu1 %v401_v12  ;;  %v383_v8 = vld [vmem:[%s1336_s4 + $0x190] sm:$0xff]  ;;  %v386_v10 = vld [vmem:[%s1336_s4 + $0x1a8] sm:$0xff]  ;;  %v353_v11 = vld [vmem:[%s1336_s4 + $0xa0] sm:$0xff] }
  0x45   : > { %453 = vmatprep.subr.mxu0 %v1224_v0  ;;  %992 = vmatprep.subr.mxu1 %v1224_v0  ;;  %v385_v12 = vld [vmem:[%s1336_s4 + $0x1a0] sm:$0xff] }
  0x46   : > { %454 = vmatpush1.msra.mxu0 %v400_v13  ;;  %1024 = vmatpush1.msra.mxu1 %v400_v13  ;;  %v356_v13 = vld [vmem:[%s1336_s4 + $0xb8] sm:$0xff] }
  0x47   : > { %455 = vmatprep.subr.mxu0 %v1224_v0  ;;  %993 = vmatprep.subr.mxu1 %v1224_v0 }
  0x48   : > { %456 = vmatpush1.msra.mxu0 %v399_v14  ;;  %1025 = vmatpush1.msra.mxu1 %v399_v14  ;;  %v388_v14 = vld [vmem:[%s1336_s4 + $0x1b8] sm:$0xff] }
  0x49   : > { %457 = vmatprep.subr.mxu0 %v1224_v0  ;;  %994 = vmatprep.subr.mxu1 %v1224_v0 }
  0x4a   : > { %458 = vmatpush1.msra.mxu0 %v398_v15  ;;  %1026 = vmatpush1.msra.mxu1 %v398_v15  ;;  %v355_v15 = vld [vmem:[%s1336_s4 + $0xb0] sm:$0xff] }
  0x4b   : > { %459 = vmatprep.subr.mxu0 %v1224_v0  ;;  %995 = vmatprep.subr.mxu1 %v1224_v0 }
  0x4c   : > { %460 = vmatpush1.msra.mxu0 %v397_v16  ;;  %1027 = vmatpush1.msra.mxu1 %v397_v16  ;;  %v387_v16 = vld [vmem:[%s1336_s4 + $0x1b0] sm:$0xff] }
  0x4d   : > { %461 = vmatprep.subr.mxu0 %v1224_v0  ;;  %996 = vmatprep.subr.mxu1 %v1224_v0 }
  0x4e   : > { %462 = vmatpush2.msra.mxu0 %v428_v17  ;;  %1028 = vmatpush2.msra.mxu1 %v428_v17  ;;  %v358_v17 = vld [vmem:[%s1336_s4 + $0xc8] sm:$0xff] }
  0x4f   : > { %463 = vmatprep.subr.mxu0 %v1224_v0  ;;  %997 = vmatprep.subr.mxu1 %v1224_v0 }
  0x50   : > { %464 = vmatpush2.msra.mxu0 %v427_v18  ;;  %1029 = vmatpush2.msra.mxu1 %v427_v18  ;;  %v390_v18 = vld [vmem:[%s1336_s4 + $0x1c8] sm:$0xff] }
  0x51   : > { %465 = vmatprep.subr.mxu0 %v1224_v0  ;;  %998 = vmatprep.subr.mxu1 %v1224_v0 }
  0x52   : > { %466 = vmatpush2.msra.mxu0 %v426_v19  ;;  %1030 = vmatpush2.msra.mxu1 %v426_v19  ;;  %v357_v19 = vld [vmem:[%s1336_s4 + $0xc0] sm:$0xff] }
  0x53   : > { %467 = vmatprep.subr.mxu0 %v1224_v0  ;;  %999 = vmatprep.subr.mxu1 %v1224_v0 }
  0x54   : > { %468 = vmatpush2.msra.mxu0 %v425_v20  ;;  %1031 = vmatpush2.msra.mxu1 %v425_v20  ;;  %v389_v20 = vld [vmem:[%s1336_s4 + $0x1c0] sm:$0xff] }
  0x55   : > { %469 = vmatprep.subr.mxu0 %v1224_v0  ;;  %1000 = vmatprep.subr.mxu1 %v1224_v0 }
  0x56   : > { %470 = vmatpush2.msra.mxu0 %v424_v21  ;;  %1032 = vmatpush2.msra.mxu1 %v424_v21  ;;  %v360_v21 = vld [vmem:[%s1336_s4 + $0xd8] sm:$0xff] }
  0x57   : > { %471 = vmatprep.subr.mxu0 %v1224_v0  ;;  %1001 = vmatprep.subr.mxu1 %v1224_v0 }
  0x58   : > { %472 = vmatpush2.msra.mxu0 %v423_v22  ;;  %1033 = vmatpush2.msra.mxu1 %v423_v22  ;;  %v392_v22 = vld [vmem:[%s1336_s4 + $0x1d8] sm:$0xff] }
  0x59   : > { %473 = vmatprep.subr.mxu0 %v1224_v0  ;;  %1002 = vmatprep.subr.mxu1 %v1224_v0 }
  0x5a   : > { %474 = vmatpush2.msra.mxu0 %v422_v23  ;;  %1034 = vmatpush2.msra.mxu1 %v422_v23  ;;  %v359_v23 = vld [vmem:[%s1336_s4 + $0xd0] sm:$0xff] }
  0x5b   : > { %475 = vmatprep.subr.mxu0 %v1224_v0  ;;  %1003 = vmatprep.subr.mxu1 %v1224_v0 }
  0x5c   : > { %476 = vmatpush2.msra.mxu0 %v421_v24  ;;  %1035 = vmatpush2.msra.mxu1 %v421_v24  ;;  %v391_v24 = vld [vmem:[%s1336_s4 + $0x1d0] sm:$0xff] }
  0x5d   : > { %477 = vmatprep.subr.mxu0 %v1224_v0  ;;  %1004 = vmatprep.subr.mxu1 %v1224_v0 }
  0x5e   : > { %478 = vmatpush2.msra.mxu0 %v420_v25  ;;  %1036 = vmatpush2.msra.mxu1 %v420_v25  ;;  %v362_v25 = vld [vmem:[%s1336_s4 + $0xe8] sm:$0xff] }
  0x5f   : > { %479 = vmatprep.subr.mxu0 %v1224_v0  ;;  %1005 = vmatprep.subr.mxu1 %v1224_v0 }
  0x60   : > { %480 = vmatpush2.msra.mxu0 %v419_v26  ;;  %1037 = vmatpush2.msra.mxu1 %v419_v26  ;;  %v394_v26 = vld [vmem:[%s1336_s4 + $0x1e8] sm:$0xff] }
  0x61   : > { %481 = vmatprep.subr.mxu0 %v1224_v0  ;;  %1006 = vmatprep.subr.mxu1 %v1224_v0 }
  0x62   : > { %482 = vmatpush2.msra.mxu0 %v418_v27  ;;  %1038 = vmatpush2.msra.mxu1 %v418_v27  ;;  %v361_v27 = vld [vmem:[%s1336_s4 + $0xe0] sm:$0xff] }
  0x63   : > { %483 = vmatprep.subr.mxu0 %v1224_v0  ;;  %1007 = vmatprep.subr.mxu1 %v1224_v0 }
  0x64   : > { %484 = vmatpush2.msra.mxu0 %v417_v28  ;;  %1039 = vmatpush2.msra.mxu1 %v417_v28  ;;  %v393_v28 = vld [vmem:[%s1336_s4 + $0x1e0] sm:$0xff] }
  0x65   : > { %485 = vmatprep.subr.mxu0 %v1224_v0  ;;  %1008 = vmatprep.subr.mxu1 %v1224_v0 }
  0x66   : > { %486 = vmatpush2.msra.mxu0 %v416_v29  ;;  %1040 = vmatpush2.msra.mxu1 %v416_v29  ;;  %v364_v29 = vld [vmem:[%s1336_s4 + $0xf8] sm:$0xff] }
  0x67   : > { %487 = vmatprep.subr.mxu0 %v1224_v0  ;;  %1009 = vmatprep.subr.mxu1 %v1224_v0 }
  0x68   : > { %488 = vmatpush2.msra.mxu0 %v415_v30  ;;  %1041 = vmatpush2.msra.mxu1 %v415_v30  ;;  %v396_v30 = vld [vmem:[%s1336_s4 + $0x1f8] sm:$0xff] }
  0x69   : > { %489 = vmatprep.subr.mxu0 %v1224_v0  ;;  %1010 = vmatprep.subr.mxu1 %v1224_v0 }
  0x6a   : > { %490 = vmatpush2.msra.mxu0 %v414_v31  ;;  %1042 = vmatpush2.msra.mxu1 %v414_v31  ;;  %v363_v31 = vld [vmem:[%s1336_s4 + $0xf0] sm:$0xff] }
  0x6b   : > { %491 = vmatprep.subr.mxu0 %v1224_v0  ;;  %1011 = vmatprep.subr.mxu1 %v1224_v0  ;;  %v379_v0 = vld [vmem:[%s1336_s4 + $0x170] sm:$0xff] }
  0x6c   : > { %492 = vmatpush2.msra.mxu0 %v413_v32  ;;  %1043 = vmatpush2.msra.mxu1 %v413_v32  ;;  %v395_v32 = vld [vmem:[%s1336_s4 + $0x1f0] sm:$0xff]  ;;  %s979_s4 = sshll.u32 %s1211_s15, 12  ;;  %s825_s15 = scalar_lea.sflag [#allocation5], %s1332_s28 }
  0x6d   : > { %493 = vmatprep.mubr.f32.mxu0 %v334_v33  ;;  %573 = vmatprep.mubr.f32.mxu1 %v366_v34  ;;  %v1570_v33 = vld [vmem:[%s1695_s2] ss:$0 sm:$0xff]  ;;  %s1639_s22 = scalar_lea.hbm %s1696_s3, %s979_s4 }
  0x6e   : > { %494 = vmatmul.mubr.f32.vlgmr.msra.gmra.mxu0 %v333_v35  ;;  %574 = vmatmul.mubr.f32.vlgmr.msra.gmra.mxu1 %v365_v36 }
  0x6f   : > { %498 = vmatprep.mubr.f32.mxu0 %v336_v37  ;;  %578 = vmatprep.mubr.f32.mxu1 %v368_v38 }
  0x72   : > { %499 = vmatmul.mubr.f32.gmra.mxu0 %v335_v39  ;;  %579 = vmatmul.mubr.f32.gmra.mxu1 %v367_v40 }
  0x73   : > { %503 = vmatprep.mubr.f32.mxu0 %v338_v41  ;;  %583 = vmatprep.mubr.f32.mxu1 %v370_v42 }
  0x76   : > { %504 = vmatmul.mubr.f32.gmra.mxu0 %v337_v43  ;;  %584 = vmatmul.mubr.f32.gmra.mxu1 %v369_v44 }
  0x77   : > { %508 = vmatprep.mubr.f32.mxu0 %v340_v45  ;;  %588 = vmatprep.mubr.f32.mxu1 %v372_v46 }
  0x7a   : > { %509 = vmatmul.mubr.f32.gmra.mxu0 %v339_v47  ;;  %589 = vmatmul.mubr.f32.gmra.mxu1 %v371_v48 }
  0x7b   : > { %513 = vmatprep.mubr.f32.mxu0 %v342_v49  ;;  %593 = vmatprep.mubr.f32.mxu1 %v374_v50 }
  0x7e   : > { %514 = vmatmul.mubr.f32.gmra.mxu0 %v341_v51  ;;  %594 = vmatmul.mubr.f32.gmra.mxu1 %v373_v52 }
  0x7f   : > { %518 = vmatprep.mubr.f32.mxu0 %v344_v53  ;;  %598 = vmatprep.mubr.f32.mxu1 %v376_v54 }
  0x82   : > { %519 = vmatmul.mubr.f32.gmra.mxu0 %v343_v55  ;;  %599 = vmatmul.mubr.f32.gmra.mxu1 %v375_v56 }
  0x83   : > { %523 = vmatprep.mubr.f32.mxu0 %v346_v57  ;;  %603 = vmatprep.mubr.f32.mxu1 %v378_v58 }
  0x86   : > { %524 = vmatmul.mubr.f32.gmra.mxu0 %v345_v59  ;;  %604 = vmatmul.mubr.f32.gmra.mxu1 %v377_v60 }
  0x87   : > { %528 = vmatprep.mubr.f32.mxu0 %v348_v61  ;;  %608 = vmatprep.mubr.f32.mxu1 %v380_v62 }
  0x8a   : > { %529 = vmatmul.mubr.f32.gmra.mxu0 %v347_v63  ;;  %609 = vmatmul.mubr.f32.gmra.mxu1 %v379_v0 }
  0x8b   : > { %533 = vmatprep.mubr.f32.mxu0 %v350_v1  ;;  %613 = vmatprep.mubr.f32.mxu1 %v382_v2 }
  0x8e   : > { %534 = vmatmul.mubr.f32.gmra.mxu0 %v349_v3  ;;  %614 = vmatmul.mubr.f32.gmra.mxu1 %v381_v4 }
  0x8f   : > { %538 = vmatprep.mubr.f32.mxu0 %v352_v5  ;;  %618 = vmatprep.mubr.f32.mxu1 %v384_v6 }
  0x92   : > { %539 = vmatmul.mubr.f32.gmra.mxu0 %v351_v7  ;;  %619 = vmatmul.mubr.f32.gmra.mxu1 %v383_v8 }
  0x93   : > { %543 = vmatprep.mubr.f32.mxu0 %v354_v9  ;;  %623 = vmatprep.mubr.f32.mxu1 %v386_v10 }
  0x96   : > { %544 = vmatmul.mubr.f32.gmra.mxu0 %v353_v11  ;;  %624 = vmatmul.mubr.f32.gmra.mxu1 %v385_v12 }
  0x97   : > { %548 = vmatprep.mubr.f32.mxu0 %v356_v13  ;;  %628 = vmatprep.mubr.f32.mxu1 %v388_v14 }
  0x9a   : > { %549 = vmatmul.mubr.f32.gmra.mxu0 %v355_v15  ;;  %629 = vmatmul.mubr.f32.gmra.mxu1 %v387_v16 }
  0x9b   : > { %553 = vmatprep.mubr.f32.mxu0 %v358_v17  ;;  %633 = vmatprep.mubr.f32.mxu1 %v390_v18 }
  0x9e   : > { %554 = vmatmul.mubr.f32.gmra.mxu0 %v357_v19  ;;  %634 = vmatmul.mubr.f32.gmra.mxu1 %v389_v20 }
  0x9f   : > { %558 = vmatprep.mubr.f32.mxu0 %v360_v21  ;;  %638 = vmatprep.mubr.f32.mxu1 %v392_v22 }
  0xa2   : > { %559 = vmatmul.mubr.f32.gmra.mxu0 %v359_v23  ;;  %639 = vmatmul.mubr.f32.gmra.mxu1 %v391_v24 }
  0xa3   : > { %563 = vmatprep.mubr.f32.mxu0 %v362_v25  ;;  %643 = vmatprep.mubr.f32.mxu1 %v394_v26 }
  0xa6   : > { %564 = vmatmul.mubr.f32.gmra.mxu0 %v361_v27  ;;  %644 = vmatmul.mubr.f32.gmra.mxu1 %v393_v28 }
  0xa7   : > { %568 = vmatprep.mubr.f32.mxu0 %v364_v29  ;;  %648 = vmatprep.mubr.f32.mxu1 %v396_v30 }
  0xaa   : > { %569 = vmatmul.mubr.f32.gmra.mxu0 %v363_v31  ;;  %649 = vmatmul.mubr.f32.gmra.mxu1 %v395_v32 }
 0x12e   : > { %v495_v34 = vpop.f32.mrf.mxu0  ;;  %v575_v35 = vpop.f32.mrf.mxu1 }
 0x12f   : > { %v760_v36 = vadd.f32 %v1570_v33, %v495_v34  ;;  %v776_v37 = vadd.f32 %v1570_v33, %v575_v35 }
 0x130   : > { %v497_v38 = vpop.f32.mrf.mxu0  ;;  %v577_v39 = vpop.f32.mrf.mxu1 }
 0x131   : > { %792 = vst [vmem:[%s1574_s11] sm:$0xff] %v760_v36  ;;  %808 = vst [vmem:[%s1574_s11 + $0x80] sm:$0xff] %v776_v37 }
 0x132   : > { %v500_v40 = vpop.f32.mrf.mxu0  ;;  %v580_v41 = vpop.f32.mrf.mxu1 }
 0x133   : > { %v761_v42 = vadd.f32 %v1570_v33, %v500_v40  ;;  %v777_v43 = vadd.f32 %v1570_v33, %v580_v41 }
 0x134   : > { %v502_v44 = vpop.f32.mrf.mxu0  ;;  %v582_v45 = vpop.f32.mrf.mxu1 }
 0x135   : > { %793 = vst [vmem:[%s1574_s11 + $0x8] sm:$0xff] %v761_v42  ;;  %809 = vst [vmem:[%s1574_s11 + $0x88] sm:$0xff] %v777_v43 }
 0x136   : > { %v505_v46 = vpop.f32.mrf.mxu0  ;;  %v585_v47 = vpop.f32.mrf.mxu1 }
 0x137   : > { %v762_v48 = vadd.f32 %v1570_v33, %v505_v46  ;;  %v778_v49 = vadd.f32 %v1570_v33, %v585_v47 }
 0x138   : > { %v507_v50 = vpop.f32.mrf.mxu0  ;;  %v587_v51 = vpop.f32.mrf.mxu1 }
 0x139   : > { %794 = vst [vmem:[%s1574_s11 + $0x10] sm:$0xff] %v762_v48  ;;  %810 = vst [vmem:[%s1574_s11 + $0x90] sm:$0xff] %v778_v49 }
 0x13a   : > { %v510_v52 = vpop.f32.mrf.mxu0  ;;  %v590_v53 = vpop.f32.mrf.mxu1 }
 0x13b   : > { %v763_v54 = vadd.f32 %v1570_v33, %v510_v52  ;;  %v779_v55 = vadd.f32 %v1570_v33, %v590_v53 }
 0x13c   : > { %v512_v56 = vpop.f32.mrf.mxu0  ;;  %v592_v57 = vpop.f32.mrf.mxu1 }
 0x13d   : > { %795 = vst [vmem:[%s1574_s11 + $0x18] sm:$0xff] %v763_v54  ;;  %811 = vst [vmem:[%s1574_s11 + $0x98] sm:$0xff] %v779_v55 }
 0x13e   : > { %v515_v58 = vpop.f32.mrf.mxu0  ;;  %v595_v59 = vpop.f32.mrf.mxu1 }
 0x13f   : > { %v764_v60 = vadd.f32 %v1570_v33, %v515_v58  ;;  %v780_v61 = vadd.f32 %v1570_v33, %v595_v59 }
 0x140   : > { %v517_v62 = vpop.f32.mrf.mxu0  ;;  %v597_v63 = vpop.f32.mrf.mxu1 }
 0x141   : > { %796 = vst [vmem:[%s1574_s11 + $0x20] sm:$0xff] %v764_v60  ;;  %812 = vst [vmem:[%s1574_s11 + $0xa0] sm:$0xff] %v780_v61 }
 0x142   : > { %v520_v0 = vpop.f32.mrf.mxu0  ;;  %v600_v1 = vpop.f32.mrf.mxu1 }
 0x143   : > { %v765_v2 = vadd.f32 %v1570_v33, %v520_v0  ;;  %v781_v3 = vadd.f32 %v1570_v33, %v600_v1 }
 0x144   : > { %v522_v4 = vpop.f32.mrf.mxu0  ;;  %v602_v5 = vpop.f32.mrf.mxu1 }
 0x145   : > { %797 = vst [vmem:[%s1574_s11 + $0x28] sm:$0xff] %v765_v2  ;;  %813 = vst [vmem:[%s1574_s11 + $0xa8] sm:$0xff] %v781_v3 }
 0x146   : > { %v525_v6 = vpop.f32.mrf.mxu0  ;;  %v605_v7 = vpop.f32.mrf.mxu1 }
 0x147   : > { %v766_v8 = vadd.f32 %v1570_v33, %v525_v6  ;;  %v782_v9 = vadd.f32 %v1570_v33, %v605_v7 }
 0x148   : > { %v527_v10 = vpop.f32.mrf.mxu0  ;;  %v607_v11 = vpop.f32.mrf.mxu1 }
 0x149   : > { %798 = vst [vmem:[%s1574_s11 + $0x30] sm:$0xff] %v766_v8  ;;  %814 = vst [vmem:[%s1574_s11 + $0xb0] sm:$0xff] %v782_v9 }
 0x14a   : > { %v530_v12 = vpop.f32.mrf.mxu0  ;;  %v610_v13 = vpop.f32.mrf.mxu1 }
 0x14b   : > { %v767_v14 = vadd.f32 %v1570_v33, %v530_v12  ;;  %v783_v15 = vadd.f32 %v1570_v33, %v610_v13 }
 0x14c   : > { %v532_v16 = vpop.f32.mrf.mxu0  ;;  %v612_v17 = vpop.f32.mrf.mxu1 }
 0x14d   : > { %799 = vst [vmem:[%s1574_s11 + $0x38] sm:$0xff] %v767_v14  ;;  %815 = vst [vmem:[%s1574_s11 + $0xb8] sm:$0xff] %v783_v15 }
 0x14e   : > { %v535_v18 = vpop.f32.mrf.mxu0  ;;  %v615_v19 = vpop.f32.mrf.mxu1 }
 0x14f   : > { %v768_v20 = vadd.f32 %v1570_v33, %v535_v18  ;;  %v784_v21 = vadd.f32 %v1570_v33, %v615_v19 }
 0x150   : > { %v537_v22 = vpop.f32.mrf.mxu0  ;;  %v617_v23 = vpop.f32.mrf.mxu1 }
 0x151   : > { %800 = vst [vmem:[%s1574_s11 + $0x40] sm:$0xff] %v768_v20  ;;  %816 = vst [vmem:[%s1574_s11 + $0xc0] sm:$0xff] %v784_v21 }
 0x152   : > { %v540_v24 = vpop.f32.mrf.mxu0  ;;  %v620_v25 = vpop.f32.mrf.mxu1 }
 0x153   : > { %v769_v26 = vadd.f32 %v1570_v33, %v540_v24  ;;  %v785_v27 = vadd.f32 %v1570_v33, %v620_v25 }
 0x154   : > { %v542_v28 = vpop.f32.mrf.mxu0  ;;  %v622_v29 = vpop.f32.mrf.mxu1 }
 0x155   : > { %801 = vst [vmem:[%s1574_s11 + $0x48] sm:$0xff] %v769_v26  ;;  %817 = vst [vmem:[%s1574_s11 + $0xc8] sm:$0xff] %v785_v27 }
 0x156   : > { %v545_v30 = vpop.f32.mrf.mxu0  ;;  %v625_v31 = vpop.f32.mrf.mxu1 }
 0x157   : > { %v770_v32 = vadd.f32 %v1570_v33, %v545_v30  ;;  %v786_v34 = vadd.f32 %v1570_v33, %v625_v31 }
 0x158   : > { %v547_v35 = vpop.f32.mrf.mxu0  ;;  %v627_v36 = vpop.f32.mrf.mxu1 }
 0x159   : > { %802 = vst [vmem:[%s1574_s11 + $0x50] sm:$0xff] %v770_v32  ;;  %818 = vst [vmem:[%s1574_s11 + $0xd0] sm:$0xff] %v786_v34 }
 0x15a   : > { %v550_v37 = vpop.f32.mrf.mxu0  ;;  %v630_v38 = vpop.f32.mrf.mxu1 }
 0x15b   : > { %v771_v39 = vadd.f32 %v1570_v33, %v550_v37  ;;  %v787_v40 = vadd.f32 %v1570_v33, %v630_v38 }
 0x15c   : > { %v552_v41 = vpop.f32.mrf.mxu0  ;;  %v632_v42 = vpop.f32.mrf.mxu1 }
 0x15d   : > { %803 = vst [vmem:[%s1574_s11 + $0x58] sm:$0xff] %v771_v39  ;;  %819 = vst [vmem:[%s1574_s11 + $0xd8] sm:$0xff] %v787_v40 }
 0x15e   : > { %v555_v43 = vpop.f32.mrf.mxu0  ;;  %v635_v44 = vpop.f32.mrf.mxu1 }
 0x15f   : > { %v772_v45 = vadd.f32 %v1570_v33, %v555_v43  ;;  %v788_v46 = vadd.f32 %v1570_v33, %v635_v44 }
 0x160   : > { %v557_v47 = vpop.f32.mrf.mxu0  ;;  %v637_v48 = vpop.f32.mrf.mxu1 }
 0x161   : > { %804 = vst [vmem:[%s1574_s11 + $0x60] sm:$0xff] %v772_v45  ;;  %820 = vst [vmem:[%s1574_s11 + $0xe0] sm:$0xff] %v788_v46 }
 0x162   : > { %v560_v49 = vpop.f32.mrf.mxu0  ;;  %v640_v50 = vpop.f32.mrf.mxu1 }
 0x163   : > { %v773_v51 = vadd.f32 %v1570_v33, %v560_v49  ;;  %v789_v52 = vadd.f32 %v1570_v33, %v640_v50 }
 0x164   : > { %v562_v53 = vpop.f32.mrf.mxu0  ;;  %v642_v54 = vpop.f32.mrf.mxu1 }
 0x165   : > { %805 = vst [vmem:[%s1574_s11 + $0x68] sm:$0xff] %v773_v51  ;;  %821 = vst [vmem:[%s1574_s11 + $0xe8] sm:$0xff] %v789_v52 }
 0x166   : > { %v565_v55 = vpop.f32.mrf.mxu0  ;;  %v645_v56 = vpop.f32.mrf.mxu1 }
 0x167   : > { %v774_v57 = vadd.f32 %v1570_v33, %v565_v55  ;;  %v790_v58 = vadd.f32 %v1570_v33, %v645_v56 }
 0x168   : > { %v567_v59 = vpop.f32.mrf.mxu0  ;;  %v647_v60 = vpop.f32.mrf.mxu1 }
 0x169   : > { %806 = vst [vmem:[%s1574_s11 + $0x70] sm:$0xff] %v774_v57  ;;  %822 = vst [vmem:[%s1574_s11 + $0xf0] sm:$0xff] %v790_v58 }
 0x16a   : > { %v570_v61 = vpop.f32.mrf.mxu0  ;;  %v650_v62 = vpop.f32.mrf.mxu1 }
 0x16b   : > { %v775_v63 = vadd.f32 %v1570_v33, %v570_v61  ;;  %v791_v0 = vadd.f32 %v1570_v33, %v650_v62 }
 0x16c   : > { %v572_v1 = vpop.f32.mrf.mxu0  ;;  %v652_v2 = vpop.f32.mrf.mxu1 }
 0x16d   : > { %807 = vst [vmem:[%s1574_s11 + $0x78] sm:$0xff] %v775_v63  ;;  %823 = vst [vmem:[%s1574_s11 + $0xf8] sm:$0xff] %v791_v0 }
 0x16e   : > { %1152 = shalt.err (!%p1149_p6)
}
 0x16f   : > { %s1153_s6 = scalar_lea.hbm %s1639_s22, 4096  ;;  %s1157_s24 = scalar_lea.hbm %s1696_s3, 8192 }
 0x170   : > { %p1154_p7 = scmp.ne.s32.totalorder %s1639_s22, %s1153_s6  ;;  %p1158_p13 = scmp.lt.s32.totalorder %s1639_s22, %s1696_s3 }
 0x171   : > { %p1159_p2 = scmp.lt.s32.totalorder %s1157_s24, %s1153_s6 }
 0x172   : > { %p1155_p10 = pnand %p1154_p7, %p1299_p9 }
 0x173   : > { %p1160_p8 = por %p1159_p2, %p1158_p13 }
 0x174   : > { %p1156_p4 = pneg %p1155_p10 }
 0x176   : > { %p1161_p12 = pnand %p1160_p8, %p1156_p4 }
 0x178   : > { %1164 = shalt.err (!%p1161_p12)
}
 0x179   : > { %s1226_s11 = smov 128   ;;  %s1227_s4 = smov 8  }
 0x17a   : > { %1046 = dma.vmem_to_hbm [thread:$0]  (%p1299_p9), %s1641_s18, 4096, %s1639_s22, %s825_s15, %s1226_s11, %s1226_s11, %s1227_s4  }
 0x17b PF: > { %s854_s19 = sand.u32 1, %s1199_s12   ;;  %p1702_p0 = scmp.ge.s32.totalorder %s1219_s17, 2 }
 0x17c   : > { %s855_s21 = scalar_lea.sflag [#allocation5], %s854_s19 }
 0x17d   : > { %p1053_p1 = pnand %p1702_p0, %p1306_p11 }
 0x17f   : > { %p1054_p3 = pneg %p1053_p1 }
 0x181   : > { %1194 = dma.done.wait (%p1054_p3), %s855_s21, 4096  }
 0x182   : > { %1196 = vsyncadd (%p1054_p3), %s855_s21, 4294963200  ;;  %s19_s17 = sadd.s32 1, %s1219_s17   ;;  %s1703_s12 = smov %s1203_s13 }
 0x183   : > { %p16_p5 = scmp.ge.s32.totalorder %s19_s17, 4   ;;  %s1704_s13 = smov %s1207_s14 }
 0x184   : > { %s1705_s14 = smov %s1304_s26  ;;  %s1706_s15 = smov %s1215_s16 }
 0x185   : > { %s1707_s16 = smov %s1709_s20  ;;  %18 = sbr.rel (!%p16_p5) target bundleno = 6 (0x6), region = 91 }
 0x18a   :  { %860 = vsyncpa [#allocation4], 1 }
 0x18b   :  { %862 = vsyncpa [#allocation4 + $0x1], 1 }
 0x18c   :  { %863 = vsyncpa [#allocation5], 1 }
 0x18d   :  { %865 = vsyncpa [#allocation5 + $0x1], 1 }

</bundles_post_ra>
